<compile_context>
chip_gen: v5e
topology: v5e:2x2
jax: 0.10.0
libtpu: 0.0.40
codegen_flags: <defaults>
</compile_context>

<pallas_src>
import numpy as np
import jax
import jax.numpy as jnp
from jax.experimental import pallas as pl
from jax.experimental.pallas import tpu as pltpu

INPUT = 1     # nn.LSTM input_size
HIDDEN = 50   # nn.LSTM hidden_size
HP = 128      # lane-padded hidden size used inside the kernel


# ----------------------------------------------------------------------------
# Pallas kernel: whole sequence in one invocation; recurrence via fori_loop.
# ----------------------------------------------------------------------------
def lstm_kernel(x_ref, wih_ref, b_ref, whh_ref, wout_ref, bout_ref,
                y_ref, xg_ref, hh_ref, h_ref, c_ref):
    TB = x_ref.shape[0]          # T * Bp
    Bp = h_ref.shape[0]          # padded batch (multiple of 8)
    T = TB // Bp

    # Input contribution for every timestep, computed once, off the serial
    # per-step chain:  x * W_ih^T + (b_ih + b_hh)  ->  (T*Bp, 4*HP)
    xg_ref[...] = x_ref[...] * wih_ref[...] + b_ref[...]

    h_ref[...] = jnp.zeros_like(h_ref)
    c_ref[...] = jnp.zeros_like(c_ref)

    def step(t, carry):
        base = pl.multiple_of(t * Bp, Bp)
        gates = xg_ref[pl.ds(base, Bp), :] + jnp.dot(
            h_ref[...], whh_ref[...], preferred_element_type=jnp.float32)
        i = jax.nn.sigmoid(gates[:, 0 * HP:1 * HP])
        f = jax.nn.sigmoid(gates[:, 1 * HP:2 * HP])
        g = jnp.tanh(gates[:, 2 * HP:3 * HP])
        o = jax.nn.sigmoid(gates[:, 3 * HP:4 * HP])
        c = f * c_ref[...] + i * g
        h = o * jnp.tanh(c)
        c_ref[...] = c
        h_ref[...] = h
        hh_ref[pl.ds(base, Bp), :] = h           # lane-dense h history slab
        return carry

    jax.lax.fori_loop(0, T, step, 0)

    # Linear(50 -> 1) over all timesteps at once: one matmul + one store,
    # instead of a tiny N=1 MXU op and masked 1-lane store per timestep.
    y_ref[...] = (jnp.dot(hh_ref[...], wout_ref[...],
                          preferred_element_type=jnp.float32)
                  + bout_ref[...]).astype(y_ref.dtype)


# ----------------------------------------------------------------------------
# Wrapper
# ----------------------------------------------------------------------------
def lstm_forward(x, packed_params):
    """x: (B, T, 1) float32 (batch_first, like the PyTorch module)."""
    B, T, I = x.shape
    assert I == INPUT
    wih, b, whh, wout, bout = packed_params

    Bp = max(8, ((B + 7) // 8) * 8)                       # sublane-pad batch
    x_tm = jnp.transpose(x, (1, 0, 2))                    # (T, B, 1) time-major
    x_tm = jnp.pad(x_tm, ((0, 0), (0, Bp - B), (0, 0)))   # (T, Bp, 1)
    x_flat = x_tm.reshape(T * Bp, INPUT)                  # row = t*Bp + b

    vmem = pl.BlockSpec(memory_space=pltpu.MemorySpace.VMEM)
    y_flat = pl.pallas_call(
        lstm_kernel,
        out_shape=jax.ShapeDtypeStruct((T * Bp, 1), jnp.float32),
        in_specs=[vmem] * 6,
        out_specs=vmem,
        scratch_shapes=[
            pltpu.VMEM((T * Bp, 4 * HP), jnp.float32),    # precomputed x-gates
            pltpu.VMEM((T * Bp, HP), jnp.float32),        # h history slab
            pltpu.VMEM((Bp, HP), jnp.float32),            # h state
            pltpu.VMEM((Bp, HP), jnp.float32),            # c state
        ],
    )(x_flat, wih, b, whh, wout, bout)

    y = y_flat.reshape(T, Bp, 1)[:, :B, :]                # drop padded batch rows
    return jnp.transpose(y, (1, 0, 2))                    # (B, T, 1)


# ----------------------------------------------------------------------------
# Deterministic parameter init (PyTorch default: U(-1/sqrt(H), 1/sqrt(H)))
# ----------------------------------------------------------------------------
def init_params(key):
    k = 1.0 / np.sqrt(HIDDEN)
    ks = jax.random.split(key, 6)
    W_ih = jax.random.uniform(ks[0], (4 * HIDDEN, INPUT), jnp.float32, -k, k)
    W_hh = jax.random.uniform(ks[1], (4 * HIDDEN, HIDDEN), jnp.float32, -k, k)
    b_ih = jax.random.uniform(ks[2], (4 * HIDDEN,), jnp.float32, -k, k)
    b_hh = jax.random.uniform(ks[3], (4 * HIDDEN,), jnp.float32, -k, k)
    W_lin = jax.random.uniform(ks[4], (1, HIDDEN), jnp.float32, -k, k)
    b_lin = jax.random.uniform(ks[5], (1,), jnp.float32, -k, k)
    return (W_ih, W_hh, b_ih, b_hh, W_lin, b_lin)


def pack_params(raw):
    """Transpose + zero-pad weights into the lane-aligned kernel layout."""
    W_ih, W_hh, b_ih, b_hh, W_lin, b_lin = [np.asarray(p) for p in raw]
    wih = np.zeros((INPUT, 4 * HP), np.float32)
    whh = np.zeros((HP, 4 * HP), np.float32)
    b = np.zeros((1, 4 * HP), np.float32)
    bsum = b_ih + b_hh
    for g in range(4):                      # PyTorch gate order: i, f, g, o
        wih[:, g * HP:g * HP + HIDDEN] = W_ih[g * HIDDEN:(g + 1) * HIDDEN, :].T
        whh[:HIDDEN, g * HP:g * HP + HIDDEN] = W_hh[g * HIDDEN:(g + 1) * HIDDEN, :].T
        b[0, g * HP:g * HP + HIDDEN] = bsum[g * HIDDEN:(g + 1) * HIDDEN]
    wout = np.zeros((HP, 1), np.float32)
    wout[:HIDDEN, 0] = W_lin[0, :]
    bout = b_lin.reshape(1, 1).astype(np.float32)
    return tuple(jnp.asarray(a) for a in (wih, b, whh, wout, bout))


# ----------------------------------------------------------------------------
# Pure-JAX reference (exact PyTorch LSTM semantics) for validation
# ----------------------------------------------------------------------------
def reference_forward(x, raw):
    W_ih, W_hh, b_ih, b_hh, W_lin, b_lin = raw
    B, T, _ = x.shape
    H = HIDDEN

    def step(carry, x_t):
        h, c = carry
        gates = x_t @ W_ih.T + h @ W_hh.T + b_ih + b_hh
        i = jax.nn.sigmoid(gates[:, 0:H])
        f = jax.nn.sigmoid(gates[:, H:2 * H])
        g = jnp.tanh(gates[:, 2 * H:3 * H])
        o = jax.nn.sigmoid(gates[:, 3 * H:4 * H])
        c = f * c + i * g
        h = o * jnp.tanh(c)
        return (h, c), h

    init = (jnp.zeros((B, H), jnp.float32), jnp.zeros((B, H), jnp.float32))
    _, hs = jax.lax.scan(step, init, jnp.transpose(x, (1, 0, 2)))
    hs = jnp.transpose(hs, (1, 0, 2))       # (B, T, H)
    return hs @ W_lin.T + b_lin


if __name__ == "__main__":
    key = jax.random.PRNGKey(0)
    pkey, xkey = jax.random.split(key)

    raw_params = init_params(pkey)
    packed = pack_params(raw_params)

    B, T = 2, 8                             # batch=2, seq=8, input_size=1
    x = jax.random.normal(xkey, (B, T, INPUT), jnp.float32)

    y = lstm_forward(x, packed)
    y = jax.block_until_ready(y)

    y_ref = jax.block_until_ready(reference_forward(x, raw_params))
    assert y.shape == (B, T, 1)
    np.testing.assert_allclose(np.asarray(y), np.asarray(y_ref),
                               rtol=1e-4, atol=1e-4)
    print("KERNEL_OK")
</pallas_src>

<mosaic_0001>
module attributes {stable_mosaic.version = 11 : i64} {
  func.func @lstm_kernel(%arg0: memref<64x1xf32, #tpu.memory_space<vmem>>, %arg1: memref<1x512xf32, #tpu.memory_space<vmem>>, %arg2: memref<1x512xf32, #tpu.memory_space<vmem>>, %arg3: memref<128x512xf32, #tpu.memory_space<vmem>>, %arg4: memref<128x1xf32, #tpu.memory_space<vmem>>, %arg5: memref<1x1xf32, #tpu.memory_space<vmem>>, %arg6: memref<64x1xf32, #tpu.memory_space<vmem>>, %arg7: memref<64x512xf32, #tpu.memory_space<vmem>>, %arg8: memref<64x128xf32, #tpu.memory_space<vmem>>, %arg9: memref<8x128xf32, #tpu.memory_space<vmem>>, %arg10: memref<8x128xf32, #tpu.memory_space<vmem>>) attributes {dimension_semantics = [], scalar_prefetch = 0 : i64, scratch_operands = 4 : i64, tpu.core_type = #tpu.core_type<tc>} {
    %c0 = arith.constant 0 : index
    %c0_0 = arith.constant 0 : index
    %0 = vector.load %arg0[%c0, %c0_0] : memref<64x1xf32, #tpu.memory_space<vmem>>, vector<64x1xf32>
    %c0_1 = arith.constant 0 : index
    %c0_2 = arith.constant 0 : index
    %1 = vector.load %arg1[%c0_1, %c0_2] : memref<1x512xf32, #tpu.memory_space<vmem>>, vector<1x512xf32>
    %2 = vector.broadcast %0 : vector<64x1xf32> to vector<64x512xf32>
    %3 = vector.broadcast %1 : vector<1x512xf32> to vector<64x512xf32>
    %4 = arith.mulf %2, %3 : vector<64x512xf32>
    %c0_3 = arith.constant 0 : index
    %c0_4 = arith.constant 0 : index
    %5 = vector.load %arg2[%c0_3, %c0_4] : memref<1x512xf32, #tpu.memory_space<vmem>>, vector<1x512xf32>
    %6 = vector.broadcast %5 : vector<1x512xf32> to vector<64x512xf32>
    %7 = arith.addf %4, %6 : vector<64x512xf32>
    %c0_5 = arith.constant 0 : index
    %c0_6 = arith.constant 0 : index
    %8 = vector.load %arg7[%c0_5, %c0_6] : memref<64x512xf32, #tpu.memory_space<vmem>>, vector<64x512xf32>
    tpu.vector_store %arg7[%c0_5, %c0_6], %7 {strides = array<i32>} : memref<64x512xf32, #tpu.memory_space<vmem>>, vector<64x512xf32>,
    %cst = arith.constant 0.000000e+00 : f32
    %9 = vector.broadcast %cst : f32 to vector<8x128xf32>
    %c0_7 = arith.constant 0 : index
    %c0_8 = arith.constant 0 : index
    %10 = vector.load %arg9[%c0_7, %c0_8] : memref<8x128xf32, #tpu.memory_space<vmem>>, vector<8x128xf32>
    tpu.vector_store %arg9[%c0_7, %c0_8], %9 {strides = array<i32>} : memref<8x128xf32, #tpu.memory_space<vmem>>, vector<8x128xf32>,
    %cst_9 = arith.constant 0.000000e+00 : f32
    %11 = vector.broadcast %cst_9 : f32 to vector<8x128xf32>
    %c0_10 = arith.constant 0 : index
    %c0_11 = arith.constant 0 : index
    %12 = vector.load %arg10[%c0_10, %c0_11] : memref<8x128xf32, #tpu.memory_space<vmem>>, vector<8x128xf32>
    tpu.vector_store %arg10[%c0_10, %c0_11], %11 {strides = array<i32>} : memref<8x128xf32, #tpu.memory_space<vmem>>, vector<8x128xf32>,
    %c0_i32 = arith.constant 0 : i32
    %c8_i32 = arith.constant 8 : i32
    %13 = arith.addi %c0_i32, %c8_i32 : i32
    %c1_i32 = arith.constant 1 : i32
    scf.for %arg11 = %c0_i32 to %13 step %c1_i32  : i32 {
      %c8_i32_22 = arith.constant 8 : i32
      %21 = arith.muli %arg11, %c8_i32_22 : i32
      %22 = tpu.assume_multiple %21, 8 : i32
      %23 = arith.index_cast %22 : i32 to index
      %c0_23 = arith.constant 0 : index
      %24 = vector.load %arg7[%23, %c0_23] : memref<64x512xf32, #tpu.memory_space<vmem>>, vector<8x512xf32>
      %c0_24 = arith.constant 0 : index
      %c0_25 = arith.constant 0 : index
      %25 = vector.load %arg9[%c0_24, %c0_25] : memref<8x128xf32, #tpu.memory_space<vmem>>, vector<8x128xf32>
      %c0_26 = arith.constant 0 : index
      %c0_27 = arith.constant 0 : index
      %26 = vector.load %arg3[%c0_26, %c0_27] : memref<128x512xf32, #tpu.memory_space<vmem>>, vector<128x512xf32>
      %cst_28 = arith.constant dense<0.000000e+00> : vector<8x512xf32>
      %27 = tpu.matmul %25, %26, %cst_28 {dimension_numbers = #tpu.dot_dimension_numbers<[1], [0], [0], [1], [0, 0, 1, 1], [], []>} : vector<8x128xf32>, vector<128x512xf32>, vector<8x512xf32> -> vector<8x512xf32>
      %28 = arith.addf %24, %27 : vector<8x512xf32>
      %29 = vector.extract_strided_slice %28 {offsets = [0, 0], sizes = [8, 128], strides = [1, 1]} : vector<8x512xf32> to vector<8x128xf32>
      %30 = arith.negf %29 : vector<8x128xf32>
      %31 = math.exp %30 : vector<8x128xf32>
      %cst_29 = arith.constant 1.000000e+00 : f32
      %32 = vector.broadcast %cst_29 : f32 to vector<8x128xf32>
      %33 = arith.addf %32, %31 : vector<8x128xf32>
      %34 = arith.divf %32, %33 : vector<8x128xf32>
      %35 = vector.extract_strided_slice %28 {offsets = [0, 128], sizes = [8, 128], strides = [1, 1]} : vector<8x512xf32> to vector<8x128xf32>
      %36 = arith.negf %35 : vector<8x128xf32>
      %37 = math.exp %36 : vector<8x128xf32>
      %cst_30 = arith.constant 1.000000e+00 : f32
      %38 = vector.broadcast %cst_30 : f32 to vector<8x128xf32>
      %39 = arith.addf %38, %37 : vector<8x128xf32>
      %40 = arith.divf %38, %39 : vector<8x128xf32>
      %41 = vector.extract_strided_slice %28 {offsets = [0, 256], sizes = [8, 128], strides = [1, 1]} : vector<8x512xf32> to vector<8x128xf32>
      %42 = math.tanh %41 : vector<8x128xf32>
      %43 = vector.extract_strided_slice %28 {offsets = [0, 384], sizes = [8, 128], strides = [1, 1]} : vector<8x512xf32> to vector<8x128xf32>
      %44 = arith.negf %43 : vector<8x128xf32>
      %45 = math.exp %44 : vector<8x128xf32>
      %cst_31 = arith.constant 1.000000e+00 : f32
      %46 = vector.broadcast %cst_31 : f32 to vector<8x128xf32>
      %47 = arith.addf %46, %45 : vector<8x128xf32>
      %48 = arith.divf %46, %47 : vector<8x128xf32>
      %c0_32 = arith.constant 0 : index
      %c0_33 = arith.constant 0 : index
      %49 = vector.load %arg10[%c0_32, %c0_33] : memref<8x128xf32, #tpu.memory_space<vmem>>, vector<8x128xf32>
      %50 = arith.mulf %40, %49 : vector<8x128xf32>
      %51 = arith.mulf %34, %42 : vector<8x128xf32>
      %52 = arith.addf %50, %51 : vector<8x128xf32>
      %53 = math.tanh %52 : vector<8x128xf32>
      %54 = arith.mulf %48, %53 : vector<8x128xf32>
      %c0_34 = arith.constant 0 : index
      %c0_35 = arith.constant 0 : index
      %55 = vector.load %arg10[%c0_34, %c0_35] : memref<8x128xf32, #tpu.memory_space<vmem>>, vector<8x128xf32>
      tpu.vector_store %arg10[%c0_34, %c0_35], %52 {strides = array<i32>} : memref<8x128xf32, #tpu.memory_space<vmem>>, vector<8x128xf32>,
      %c0_36 = arith.constant 0 : index
      %c0_37 = arith.constant 0 : index
      %56 = vector.load %arg9[%c0_36, %c0_37] : memref<8x128xf32, #tpu.memory_space<vmem>>, vector<8x128xf32>
      tpu.vector_store %arg9[%c0_36, %c0_37], %54 {strides = array<i32>} : memref<8x128xf32, #tpu.memory_space<vmem>>, vector<8x128xf32>,
      %57 = arith.index_cast %22 : i32 to index
      %c0_38 = arith.constant 0 : index
      %58 = vector.load %arg8[%57, %c0_38] : memref<64x128xf32, #tpu.memory_space<vmem>>, vector<8x128xf32>
      tpu.vector_store %arg8[%57, %c0_38], %54 {strides = array<i32>} : memref<64x128xf32, #tpu.memory_space<vmem>>, vector<8x128xf32>,
    }
    %c8_i32_12 = arith.constant 8 : i32
    %c0_13 = arith.constant 0 : index
    %c0_14 = arith.constant 0 : index
    %14 = vector.load %arg8[%c0_13, %c0_14] : memref<64x128xf32, #tpu.memory_space<vmem>>, vector<64x128xf32>
    %c0_15 = arith.constant 0 : index
    %c0_16 = arith.constant 0 : index
    %15 = vector.load %arg4[%c0_15, %c0_16] : memref<128x1xf32, #tpu.memory_space<vmem>>, vector<128x1xf32>
    %cst_17 = arith.constant dense<0.000000e+00> : vector<64x1xf32>
    %16 = tpu.matmul %14, %15, %cst_17 {dimension_numbers = #tpu.dot_dimension_numbers<[1], [0], [0], [1], [0, 0, 1, 1], [], []>} : vector<64x128xf32>, vector<128x1xf32>, vector<64x1xf32> -> vector<64x1xf32>
    %c0_18 = arith.constant 0 : index
    %c0_19 = arith.constant 0 : index
    %17 = vector.load %arg5[%c0_18, %c0_19] : memref<1x1xf32, #tpu.memory_space<vmem>>, vector<1x1xf32>
    %18 = vector.broadcast %17 : vector<1x1xf32> to vector<64x1xf32>
    %19 = arith.addf %16, %18 : vector<64x1xf32>
    %c0_20 = arith.constant 0 : index
    %c0_21 = arith.constant 0 : index
    %20 = vector.load %arg6[%c0_20, %c0_21] : memref<64x1xf32, #tpu.memory_space<vmem>>, vector<64x1xf32>
    tpu.vector_store %arg6[%c0_20, %c0_21], %19 {strides = array<i32>} : memref<64x1xf32, #tpu.memory_space<vmem>>, vector<64x1xf32>,
    return
  }
}

</mosaic_0001>

<bundles_post_ra>
// kernel: tpu_custom_call.1
= control target key start
LH: loop header
LB: loop body
LE: loop exit
PB: predicated region body
PF: predicated region fallthrough
CT: control target
= control target key end

     0   :  { %s903_s0 = inlined_call_operand.vmem [shape: f32[64,1], index: 0, kind: input, shape index: {}]   ;;  %s904_s1 = inlined_call_operand.vmem [shape: f32[1,512], index: 1, kind: input, shape index: {}]   ;;  %s905_s2 = inlined_call_operand.vmem [shape: f32[1,512], index: 2, kind: input, shape index: {}]   ;;  %s906_s3 = inlined_call_operand.hbm [shape: f32[128,512], index: 3, kind: input, shape index: {}]   ;;  %s907_s4 = inlined_call_operand.vmem [shape: f32[128,1], index: 4, kind: input, shape index: {}]   ;;  %s908_s5 = inlined_call_operand.<no memory space> [shape: f32[1,1], index: 5, kind: input, shape index: {}]   ;;  %s909_s6 = inlined_call_operand.vmem [shape: f32[64,1], index: 6, kind: output, shape index: {}]  }
   0x1   :  { %v11_v0 = vstv %s908_s5 }
   0x2   :  { %12 = vst [vmem:[#allocation6] sm:$0x1] %v11_v0 }
   0x3   :  { %13 = vsyncpa [#allocation8], 0  ;;  %s24_s25 = sshll.u32 %s906_s3, 4  ;;  %s654_s26 = smov [#allocation7]   ;;  %s25_s25 = int_to_ptr.hbm [resolvable:$true] %s24_s25 }
   0x4   :  { %s26_s27 = sshll.u32 %s654_s26, 4  ;;  %s655_s28 = smov 512   ;;  %s27_s27 = int_to_ptr.vmem [resolvable:$true] %s26_s27 }
   0x5   :  { %s656_s29 = smov 32  }
   0x6   :  { %32 = dma.hbm_to_vmem [thread:$0]  %s25_s25, 8192, %s27_s27, [#allocation8], %s655_s28, %s655_s28, %s656_s29  }
   0x7   :  { %648 = dma.done.wait [#allocation8], 8192  }
   0x8   :  { %649 = vsyncadd [#allocation8], 4294959104  ;;  %v657_v1 = vmov 0.0   ;;  %v658_v2 = vmov 0   ;;  %v43_v3 = vld [vmem:[%s903_s0 + $0x10] sm:$0xff]  ;;  %v41_v4 = vld [vmem:[%s903_s0] sm:$0xff] }
   0x9   :  { %205 = vst [vmem:[#allocation4] sm:$0xff] %v657_v1  ;;  %601 = vset.pattern.permute.xlu1 %v658_v2  ;;  %600 = vset.pattern.permute.xlu0 %v658_v2  ;;  %v45_v5 = vld [vmem:[%s903_s0 + $0x20] sm:$0xff]  ;;  %v44_v6 = vld [vmem:[%s903_s0 + $0x18] sm:$0xff]  ;;  %v42_v7 = vld [vmem:[%s903_s0 + $0x8] sm:$0xff] }
   0xa   :  { %206 = vst [vmem:[#allocation5] sm:$0xff] %v657_v1  ;;  %602 = vset.pattern.permute.xlu2 %v658_v2  ;;  %62 = vperm.xlu1 %601, %v43_v3   ;;  %v46_v8 = vld [vmem:[%s903_s0 + $0x28] sm:$0xff]  ;;  %v48_v9 = vld [vmem:[%s903_s0 + $0x38] sm:$0xff]  ;;  %v47_v10 = vld [vmem:[%s903_s0 + $0x30] sm:$0xff]  ;;  %s810_s0 = smov 0  }
   0xb   :  { %52 = vperm.xlu0 %600, %v41_v4   ;;  %72 = vperm.xlu2 %602, %v45_v5   ;;  %v49_v11 = vld [vmem:[%s904_s1] sm:$0xf] }
   0xc   :  { %v131_v12 = vld [vmem:[%s905_s2] sm:$0xf]  ;;  %v730_v13 = vperm.slane %v49_v11, 0  ;;  %v732_v14 = vperm.slane %v49_v11, 1  ;;  %v734_v15 = vperm.slane %v49_v11, 2  ;;  %v736_v16 = vperm.slane %v49_v11, 3 }
   0xd   :  { %v738_v17 = vperm.slane %v131_v12, 0  ;;  %v740_v18 = vperm.slane %v131_v12, 1  ;;  %v742_v19 = vperm.slane %v131_v12, 2  ;;  %v748_v25 = vperm.slane %v131_v12, 3 }
  0x12   :  { %67 = vperm.xlu1 %601, %v44_v6  }
  0x13   :  { %57 = vperm.xlu0 %600, %v42_v7   ;;  %77 = vperm.xlu2 %602, %v46_v8  }
  0x1a   :  { %87 = vperm.xlu1 %601, %v48_v9  }
  0x1b   :  { %82 = vperm.xlu0 %600, %v47_v10  }
  0x65   :  { %v73_v20 = vpop.permute.xlu2 %72 }
  0x66   :  { %v115_v21 = vmul.f32 %v730_v13, %v73_v20  ;;  %v116_v22 = vmul.f32 %v732_v14, %v73_v20  ;;  %v117_v23 = vmul.f32 %v734_v15, %v73_v20  ;;  %v118_v24 = vmul.f32 %v736_v16, %v73_v20 }
  0x68   :  { %v157_v26 = vadd.f32 %v738_v17, %v115_v21  ;;  %v158_v27 = vadd.f32 %v740_v18, %v116_v22  ;;  %v159_v28 = vadd.f32 %v742_v19, %v117_v23  ;;  %v160_v29 = vadd.f32 %v748_v25, %v118_v24 }
  0x6a   :  { %189 = vst [vmem:[#allocation2 + $0x80] sm:$0xff] %v157_v26 }
  0x6b   :  { %190 = vst [vmem:[#allocation2 + $0x88] sm:$0xff] %v158_v27 }
  0x6c   :  { %191 = vst [vmem:[#allocation2 + $0x90] sm:$0xff] %v159_v28 }
  0x6d   :  { %192 = vst [vmem:[#allocation2 + $0x98] sm:$0xff] %v160_v29  ;;  %v78_v30 = vpop.permute.xlu2 %77 }
  0x6e   :  { %v119_v31 = vmul.f32 %v730_v13, %v78_v30  ;;  %v120_v32 = vmul.f32 %v732_v14, %v78_v30  ;;  %v121_v33 = vmul.f32 %v734_v15, %v78_v30  ;;  %v122_v34 = vmul.f32 %v736_v16, %v78_v30 }
  0x70   :  { %v161_v35 = vadd.f32 %v738_v17, %v119_v31  ;;  %v162_v36 = vadd.f32 %v740_v18, %v120_v32  ;;  %v163_v37 = vadd.f32 %v742_v19, %v121_v33  ;;  %v164_v38 = vadd.f32 %v748_v25, %v122_v34 }
  0x72   :  { %193 = vst [vmem:[#allocation2 + $0xa0] sm:$0xff] %v161_v35 }
  0x73   :  { %194 = vst [vmem:[#allocation2 + $0xa8] sm:$0xff] %v162_v36 }
  0x74   :  { %195 = vst [vmem:[#allocation2 + $0xb0] sm:$0xff] %v163_v37 }
  0x75   :  { %196 = vst [vmem:[#allocation2 + $0xb8] sm:$0xff] %v164_v38 }
  0x7c   :  { %v63_v39 = vpop.permute.xlu1 %62 }
  0x7d   :  { %v53_v40 = vpop.permute.xlu0 %52  ;;  %v107_v41 = vmul.f32 %v730_v13, %v63_v39  ;;  %v108_v42 = vmul.f32 %v732_v14, %v63_v39  ;;  %v109_v43 = vmul.f32 %v734_v15, %v63_v39  ;;  %v110_v44 = vmul.f32 %v736_v16, %v63_v39 }
  0x7e   :  { %v99_v45 = vmul.f32 %v730_v13, %v53_v40  ;;  %v100_v46 = vmul.f32 %v732_v14, %v53_v40  ;;  %v101_v50 = vmul.f32 %v734_v15, %v53_v40  ;;  %v102_v52 = vmul.f32 %v736_v16, %v53_v40 }
  0x7f   :  { %v149_v47 = vadd.f32 %v738_v17, %v107_v41  ;;  %v150_v48 = vadd.f32 %v740_v18, %v108_v42  ;;  %v151_v49 = vadd.f32 %v742_v19, %v109_v43  ;;  %v152_v51 = vadd.f32 %v748_v25, %v110_v44 }
  0x80   :  { %v141_v53 = vadd.f32 %v738_v17, %v99_v45  ;;  %v142_v54 = vadd.f32 %v740_v18, %v100_v46  ;;  %v143_v55 = vadd.f32 %v742_v19, %v101_v50  ;;  %v144_v56 = vadd.f32 %v748_v25, %v102_v52 }
  0x81   :  { %181 = vst [vmem:[#allocation2 + $0x40] sm:$0xff] %v149_v47 }
  0x82   :  { %182 = vst [vmem:[#allocation2 + $0x48] sm:$0xff] %v150_v48 }
  0x83   :  { %183 = vst [vmem:[#allocation2 + $0x50] sm:$0xff] %v151_v49 }
  0x84   :  { %184 = vst [vmem:[#allocation2 + $0x58] sm:$0xff] %v152_v51  ;;  %v68_v57 = vpop.permute.xlu1 %67 }
  0x85   :  { %v58_v58 = vpop.permute.xlu0 %57  ;;  %173 = vst [vmem:[#allocation2] sm:$0xff] %v141_v53  ;;  %v111_v59 = vmul.f32 %v730_v13, %v68_v57  ;;  %v112_v60 = vmul.f32 %v732_v14, %v68_v57  ;;  %v113_v61 = vmul.f32 %v734_v15, %v68_v57  ;;  %v114_v62 = vmul.f32 %v736_v16, %v68_v57 }
  0x86   :  { %174 = vst [vmem:[#allocation2 + $0x8] sm:$0xff] %v142_v54  ;;  %v103_v63 = vmul.f32 %v730_v13, %v58_v58  ;;  %v104_v0 = vmul.f32 %v732_v14, %v58_v58  ;;  %v105_v4 = vmul.f32 %v734_v15, %v58_v58  ;;  %v106_v6 = vmul.f32 %v736_v16, %v58_v58 }
  0x87   :  { %175 = vst [vmem:[#allocation2 + $0x10] sm:$0xff] %v143_v55  ;;  %v153_v1 = vadd.f32 %v738_v17, %v111_v59  ;;  %v154_v2 = vadd.f32 %v740_v18, %v112_v60  ;;  %v155_v3 = vadd.f32 %v742_v19, %v113_v61  ;;  %v156_v5 = vadd.f32 %v748_v25, %v114_v62 }
  0x88   :  { %176 = vst [vmem:[#allocation2 + $0x18] sm:$0xff] %v144_v56  ;;  %v145_v7 = vadd.f32 %v738_v17, %v103_v63  ;;  %v146_v8 = vadd.f32 %v740_v18, %v104_v0  ;;  %v147_v9 = vadd.f32 %v742_v19, %v105_v4  ;;  %v148_v10 = vadd.f32 %v748_v25, %v106_v6 }
  0x89   :  { %185 = vst [vmem:[#allocation2 + $0x60] sm:$0xff] %v153_v1 }
  0x8a   :  { %186 = vst [vmem:[#allocation2 + $0x68] sm:$0xff] %v154_v2 }
  0x8b   :  { %187 = vst [vmem:[#allocation2 + $0x70] sm:$0xff] %v155_v3 }
  0x8c   :  { %188 = vst [vmem:[#allocation2 + $0x78] sm:$0xff] %v156_v5  ;;  %v88_v11 = vpop.permute.xlu1 %87 }
  0x8d   :  { %v83_v12 = vpop.permute.xlu0 %82  ;;  %177 = vst [vmem:[#allocation2 + $0x20] sm:$0xff] %v145_v7  ;;  %v127_v20 = vmul.f32 %v730_v13, %v88_v11  ;;  %v128_v21 = vmul.f32 %v732_v14, %v88_v11  ;;  %v129_v22 = vmul.f32 %v734_v15, %v88_v11  ;;  %v130_v23 = vmul.f32 %v736_v16, %v88_v11 }
  0x8e   :  { %178 = vst [vmem:[#allocation2 + $0x28] sm:$0xff] %v146_v8  ;;  %v123_v24 = vmul.f32 %v730_v13, %v83_v12  ;;  %v124_v26 = vmul.f32 %v732_v14, %v83_v12  ;;  %v125_v30 = vmul.f32 %v734_v15, %v83_v12  ;;  %v126_v32 = vmul.f32 %v736_v16, %v83_v12 }
  0x8f   :  { %179 = vst [vmem:[#allocation2 + $0x30] sm:$0xff] %v147_v9  ;;  %v169_v27 = vadd.f32 %v738_v17, %v127_v20  ;;  %v170_v28 = vadd.f32 %v740_v18, %v128_v21  ;;  %v171_v29 = vadd.f32 %v742_v19, %v129_v22  ;;  %v172_v31 = vadd.f32 %v748_v25, %v130_v23 }
  0x90   :  { %180 = vst [vmem:[#allocation2 + $0x38] sm:$0xff] %v148_v10  ;;  %v165_v33 = vadd.f32 %v738_v17, %v123_v24  ;;  %v166_v13 = vadd.f32 %v740_v18, %v124_v26  ;;  %v167_v14 = vadd.f32 %v742_v19, %v125_v30  ;;  %v168_v34 = vadd.f32 %v748_v25, %v126_v32 }
  0x91   :  { %201 = vst [vmem:[#allocation2 + $0xe0] sm:$0xff] %v169_v27 }
  0x92   :  { %202 = vst [vmem:[#allocation2 + $0xe8] sm:$0xff] %v170_v28 }
  0x93   :  { %203 = vst [vmem:[#allocation2 + $0xf0] sm:$0xff] %v171_v29 }
  0x94   :  { %204 = vst [vmem:[#allocation2 + $0xf8] sm:$0xff] %v172_v31 }
  0x95   :  { %197 = vst [vmem:[#allocation2 + $0xc0] sm:$0xff] %v165_v33 }
  0x96   :  { %198 = vst [vmem:[#allocation2 + $0xc8] sm:$0xff] %v166_v13 }
  0x97   :  { %199 = vst [vmem:[#allocation2 + $0xd0] sm:$0xff] %v167_v14 }
  0x98   :  { %200 = vst [vmem:[#allocation2 + $0xd8] sm:$0xff] %v168_v34 }
  0x99 LB: > { %v284_v15 = vld [vmem:[#allocation7 + $0x1e0] sm:$0xff]  ;;  %v285_v16 = vld [vmem:[#allocation7 + $0x1e8] sm:$0xff]  ;;  %v287_v17 = vld [vmem:[#allocation7 + $0x1f8] sm:$0xff]  ;;  %s532_s1 = sshll.u32 %s652_s0, 3  ;;  %s212_s0 = sadd.s32 1, %s652_s0   ;;  %s652_s0 = sphi %s810_s0, %s212_s0  }
  0x9a   : > { %288 = vmatpush.msra.mxu0 %v284_v15  ;;  %308 = vmatpush.msra.mxu1 %v285_v16  ;;  %v280_v18 = vld [vmem:[#allocation7 + $0x1c0] sm:$0xff]  ;;  %v281_v19 = vld [vmem:[#allocation7 + $0x1c8] sm:$0xff]  ;;  %v283_v35 = vld [vmem:[#allocation7 + $0x1d8] sm:$0xff]  ;;  %s214_s2 = sshra.s32 %s532_s1, 3  ;;  %s438_s26 = scalar_lea.vmem [#allocation3], %s532_s1 }
  0x9b   : > { %348 = vmatpush.msra.mxu3 %v287_v17  ;;  %v276_v25 = vld [vmem:[#allocation7 + $0x1a0] sm:$0xff]  ;;  %v277_v36 = vld [vmem:[#allocation7 + $0x1a8] sm:$0xff]  ;;  %v279_v37 = vld [vmem:[#allocation7 + $0x1b8] sm:$0xff]  ;;  %s538_s24 = sshll.u32 %s214_s2, 5  ;;  %p209_p0 = scmp.ge.s32.totalorder %s212_s0, 8  }
  0x9c   : > { %289 = vmatpush.msra.mxu0 %v280_v18  ;;  %309 = vmatpush.msra.mxu1 %v281_v19  ;;  %v272_v38 = vld [vmem:[#allocation7 + $0x180] sm:$0xff]  ;;  %v273_v39 = vld [vmem:[#allocation7 + $0x188] sm:$0xff]  ;;  %v275_v40 = vld [vmem:[#allocation7 + $0x198] sm:$0xff]  ;;  %s218_s25 = scalar_lea.vmem [#allocation2], %s538_s24  ;;  %vm509_vm12 = vcmask (%p209_p0), 7168  }
  0x9d   : > { %349 = vmatpush.msra.mxu3 %v283_v35  ;;  %v268_v41 = vld [vmem:[#allocation7 + $0x160] sm:$0xff]  ;;  %v269_v42 = vld [vmem:[#allocation7 + $0x168] sm:$0xff]  ;;  %v271_v43 = vld [vmem:[#allocation7 + $0x178] sm:$0xff] }
  0x9e   : > { %290 = vmatpush.msra.mxu0 %v276_v25  ;;  %310 = vmatpush.msra.mxu1 %v277_v36  ;;  %v264_v44 = vld [vmem:[#allocation7 + $0x140] sm:$0xff]  ;;  %v265_v45 = vld [vmem:[#allocation7 + $0x148] sm:$0xff]  ;;  %v286_v46 = vld [vmem:[#allocation7 + $0x1f0] sm:$0xff] }
  0x9f   : > { %350 = vmatpush.msra.mxu3 %v279_v37  ;;  %v267_v47 = vld [vmem:[#allocation7 + $0x158] sm:$0xff]  ;;  %v282_v48 = vld [vmem:[#allocation7 + $0x1d0] sm:$0xff]  ;;  %v260_v49 = vld [vmem:[#allocation7 + $0x120] sm:$0xff]  ;;  %328 = vmatpush.msra.mxu2 %v286_v46 }
  0xa0   : > { %291 = vmatpush.msra.mxu0 %v272_v38  ;;  %311 = vmatpush.msra.mxu1 %v273_v39  ;;  %v261_v50 = vld [vmem:[#allocation7 + $0x128] sm:$0xff]  ;;  %v263_v51 = vld [vmem:[#allocation7 + $0x138] sm:$0xff]  ;;  %v278_v52 = vld [vmem:[#allocation7 + $0x1b0] sm:$0xff] }
  0xa1   : > { %351 = vmatpush.msra.mxu3 %v275_v40  ;;  %v256_v53 = vld [vmem:[#allocation7 + $0x100] sm:$0xff]  ;;  %v257_v54 = vld [vmem:[#allocation7 + $0x108] sm:$0xff]  ;;  %329 = vmatpush.msra.mxu2 %v282_v48  ;;  %v259_v55 = vld [vmem:[#allocation7 + $0x118] sm:$0xff] }
  0xa2   : > { %292 = vmatpush.msra.mxu0 %v268_v41  ;;  %312 = vmatpush.msra.mxu1 %v269_v42  ;;  %v274_v56 = vld [vmem:[#allocation7 + $0x190] sm:$0xff]  ;;  %v252_v57 = vld [vmem:[#allocation7 + $0xe0] sm:$0xff]  ;;  %v253_v58 = vld [vmem:[#allocation7 + $0xe8] sm:$0xff] }
  0xa3   : > { %352 = vmatpush.msra.mxu3 %v271_v43  ;;  %330 = vmatpush.msra.mxu2 %v278_v52  ;;  %v255_v59 = vld [vmem:[#allocation7 + $0xf8] sm:$0xff]  ;;  %v270_v60 = vld [vmem:[#allocation7 + $0x170] sm:$0xff]  ;;  %v248_v61 = vld [vmem:[#allocation7 + $0xc0] sm:$0xff] }
  0xa4   : > { %293 = vmatpush.msra.mxu0 %v264_v44  ;;  %313 = vmatpush.msra.mxu1 %v265_v45  ;;  %v249_v62 = vld [vmem:[#allocation7 + $0xc8] sm:$0xff]  ;;  %v251_v63 = vld [vmem:[#allocation7 + $0xd8] sm:$0xff]  ;;  %v266_v0 = vld [vmem:[#allocation7 + $0x150] sm:$0xff] }
  0xa5   : > { %353 = vmatpush.msra.mxu3 %v267_v47  ;;  %331 = vmatpush.msra.mxu2 %v274_v56  ;;  %v244_v1 = vld [vmem:[#allocation7 + $0xa0] sm:$0xff]  ;;  %v245_v2 = vld [vmem:[#allocation7 + $0xa8] sm:$0xff]  ;;  %v247_v3 = vld [vmem:[#allocation7 + $0xb8] sm:$0xff] }
  0xa6   : > { %294 = vmatpush.msra.mxu0 %v260_v49  ;;  %314 = vmatpush.msra.mxu1 %v261_v50  ;;  %v262_v4 = vld [vmem:[#allocation7 + $0x130] sm:$0xff]  ;;  %v240_v5 = vld [vmem:[#allocation7 + $0x80] sm:$0xff]  ;;  %v241_v6 = vld [vmem:[#allocation7 + $0x88] sm:$0xff] }
  0xa7   : > { %354 = vmatpush.msra.mxu3 %v263_v51  ;;  %332 = vmatpush.msra.mxu2 %v270_v60  ;;  %v243_v7 = vld [vmem:[#allocation7 + $0x98] sm:$0xff]  ;;  %v258_v8 = vld [vmem:[#allocation7 + $0x110] sm:$0xff]  ;;  %v236_v9 = vld [vmem:[#allocation7 + $0x60] sm:$0xff] }
  0xa8   : > { %295 = vmatpush.msra.mxu0 %v256_v53  ;;  %315 = vmatpush.msra.mxu1 %v257_v54  ;;  %v237_v10 = vld [vmem:[#allocation7 + $0x68] sm:$0xff]  ;;  %v239_v11 = vld [vmem:[#allocation7 + $0x78] sm:$0xff]  ;;  %v254_v12 = vld [vmem:[#allocation7 + $0xf0] sm:$0xff] }
  0xa9   : > { %355 = vmatpush.msra.mxu3 %v259_v55  ;;  %333 = vmatpush.msra.mxu2 %v266_v0  ;;  %v232_v20 = vld [vmem:[#allocation7 + $0x40] sm:$0xff]  ;;  %v233_v21 = vld [vmem:[#allocation7 + $0x48] sm:$0xff]  ;;  %v235_v22 = vld [vmem:[#allocation7 + $0x58] sm:$0xff] }
  0xaa   : > { %296 = vmatpush.msra.mxu0 %v252_v57  ;;  %316 = vmatpush.msra.mxu1 %v253_v58  ;;  %v250_v23 = vld [vmem:[#allocation7 + $0xd0] sm:$0xff]  ;;  %v228_v24 = vld [vmem:[#allocation7 + $0x20] sm:$0xff]  ;;  %v229_v26 = vld [vmem:[#allocation7 + $0x28] sm:$0xff] }
  0xab   : > { %356 = vmatpush.msra.mxu3 %v255_v59  ;;  %334 = vmatpush.msra.mxu2 %v262_v4  ;;  %v231_v27 = vld [vmem:[#allocation7 + $0x38] sm:$0xff]  ;;  %v246_v28 = vld [vmem:[#allocation7 + $0xb0] sm:$0xff]  ;;  %v224_v29 = vld [vmem:[#allocation7] sm:$0xff] }
  0xac   : > { %297 = vmatpush.msra.mxu0 %v248_v61  ;;  %317 = vmatpush.msra.mxu1 %v249_v62  ;;  %v225_v30 = vld [vmem:[#allocation7 + $0x8] sm:$0xff]  ;;  %v227_v31 = vld [vmem:[#allocation7 + $0x18] sm:$0xff]  ;;  %v242_v33 = vld [vmem:[#allocation7 + $0x90] sm:$0xff] }
  0xad   : > { %357 = vmatpush.msra.mxu3 %v251_v63  ;;  %335 = vmatpush.msra.mxu2 %v258_v8  ;;  %v223_v32 = vld [vmem:[#allocation4] sm:$0xff]  ;;  %v220_v17 = vld [vmem:[%s218_s25 + $0x8] sm:$0xff]  ;;  %v222_v38 = vld [vmem:[%s218_s25 + $0x18] sm:$0xff] }
  0xae   : > { %298 = vmatpush.msra.mxu0 %v244_v1  ;;  %318 = vmatpush.msra.mxu1 %v245_v2  ;;  %v238_v13 = vld [vmem:[#allocation7 + $0x70] sm:$0xff]  ;;  %v221_v46 = vld [vmem:[%s218_s25 + $0x10] sm:$0xff] }
  0xaf   : > { %358 = vmatpush.msra.mxu3 %v247_v3  ;;  %336 = vmatpush.msra.mxu2 %v254_v12  ;;  %v234_v14 = vld [vmem:[#allocation7 + $0x50] sm:$0xff] }
  0xb0   : > { %299 = vmatpush.msra.mxu0 %v240_v5  ;;  %319 = vmatpush.msra.mxu1 %v241_v6  ;;  %v230_v34 = vld [vmem:[#allocation7 + $0x30] sm:$0xff] }
  0xb1   : > { %359 = vmatpush.msra.mxu3 %v243_v7  ;;  %337 = vmatpush.msra.mxu2 %v250_v23  ;;  %v226_v15 = vld [vmem:[#allocation7 + $0x10] sm:$0xff] }
  0xb2   : > { %300 = vmatpush.msra.mxu0 %v236_v9  ;;  %320 = vmatpush.msra.mxu1 %v237_v10  ;;  %v219_v16 = vld [vmem:[%s218_s25] sm:$0xff]  ;;  %v430_v7 = vld [vmem:[#allocation5] sm:$0xff] }
  0xb3   : > { %360 = vmatpush.msra.mxu3 %v239_v11  ;;  %338 = vmatpush.msra.mxu2 %v246_v28 }
  0xb4   : > { %301 = vmatpush.msra.mxu0 %v232_v20  ;;  %321 = vmatpush.msra.mxu1 %v233_v21 }
  0xb5   : > { %361 = vmatpush.msra.mxu3 %v235_v22  ;;  %339 = vmatpush.msra.mxu2 %v242_v33  ;;  %v462_v33 = vld [vmem:[%s907_s4 + $0x70] sm:$0xff] (%p209_p0) }
  0xb6   : > { %302 = vmatpush.msra.mxu0 %v228_v24  ;;  %322 = vmatpush.msra.mxu1 %v229_v26 }
  0xb7   : > { %362 = vmatpush.msra.mxu3 %v231_v27  ;;  %340 = vmatpush.msra.mxu2 %v238_v13  ;;  %v461_v13 = vld [vmem:[%s907_s4 + $0x68] sm:$0xff] (%p209_p0) }
  0xb8   : > { %303 = vmatpush.msra.mxu0 %v224_v29  ;;  %323 = vmatpush.msra.mxu1 %v225_v30 }
  0xb9   : > { %363 = vmatpush.msra.mxu3 %v227_v31  ;;  %304 = vmatmul.f32.vlgmr.msra.gmra.mxu0 %v223_v32 }
  0xba   : > { %324 = vmatmul.f32.vlgmr.msra.gmra.mxu1 %v223_v32  ;;  %364 = vmatmul.f32.vlgmr.msra.gmra.mxu3 %v223_v32 }
  0xbb   : > { %341 = vmatpush.msra.mxu2 %v234_v14  ;;  %v460_v14 = vld [vmem:[%s907_s4 + $0x60] sm:$0xff] (%p209_p0) }
  0xbd   : > { %342 = vmatpush.msra.mxu2 %v230_v34  ;;  %v459_v34 = vld [vmem:[%s907_s4 + $0x58] sm:$0xff] (%p209_p0) }
  0xbf   : > { %343 = vmatpush.msra.mxu2 %v226_v15  ;;  %v458_v15 = vld [vmem:[%s907_s4 + $0x50] sm:$0xff] (%p209_p0) }
  0xc0   : > { %344 = vmatmul.f32.vlgmr.msra.gmra.mxu2 %v223_v32  ;;  %v463_v32 = vld [vmem:[%s907_s4 + $0x78] sm:$0xff] (%p209_p0) }
  0xc1   :  { %540 = vmatpush.msra.mxu2 (%p209_p0), %v463_v32  ;;  %541 = vmatpush.msra.mxu3 (%p209_p0), %v463_v32 }
  0xc2   :  { %468 = vmatpush.msra.mxu0 (%p209_p0), %v463_v32  ;;  %539 = vmatpush.msra.mxu1 (%p209_p0), %v463_v32 }
  0xc3   :  { %543 = vmatpush.msra.mxu2 (%p209_p0), %v462_v33  ;;  %544 = vmatpush.msra.mxu3 (%p209_p0), %v462_v33 }
  0xc4   :  { %469 = vmatpush.msra.mxu0 (%p209_p0), %v462_v33  ;;  %542 = vmatpush.msra.mxu1 (%p209_p0), %v462_v33 }
  0xc5   :  { %546 = vmatpush.msra.mxu2 (%p209_p0), %v461_v13  ;;  %547 = vmatpush.msra.mxu3 (%p209_p0), %v461_v13 }
  0xc6   :  { %470 = vmatpush.msra.mxu0 (%p209_p0), %v461_v13  ;;  %545 = vmatpush.msra.mxu1 (%p209_p0), %v461_v13 }
  0xc7   :  { %549 = vmatpush.msra.mxu2 (%p209_p0), %v460_v14  ;;  %550 = vmatpush.msra.mxu3 (%p209_p0), %v460_v14 }
  0xc8   :  { %471 = vmatpush.msra.mxu0 (%p209_p0), %v460_v14  ;;  %548 = vmatpush.msra.mxu1 (%p209_p0), %v460_v14 }
  0xc9   :  { %552 = vmatpush.msra.mxu2 (%p209_p0), %v459_v34  ;;  %553 = vmatpush.msra.mxu3 (%p209_p0), %v459_v34 }
  0xca   :  { %472 = vmatpush.msra.mxu0 (%p209_p0), %v459_v34  ;;  %551 = vmatpush.msra.mxu1 (%p209_p0), %v459_v34 }
  0xcb   :  { %555 = vmatpush.msra.mxu2 (%p209_p0), %v458_v15  ;;  %556 = vmatpush.msra.mxu3 (%p209_p0), %v458_v15 }
  0xcc   :  { %473 = vmatpush.msra.mxu0 (%p209_p0), %v458_v15  ;;  %554 = vmatpush.msra.mxu1 (%p209_p0), %v458_v15 }
 0x136   : > { %v305_v18 = vpop.f32.mrf.mxu0 }
 0x137   : > { %v368_v19 = vadd.f32 %v305_v18, %v219_v16  ;;  %v325_v35 = vpop.f32.mrf.mxu1  ;;  %v457_v16 = vld [vmem:[%s907_s4 + $0x48] sm:$0xff] (%p209_p0)  ;;  %v455_v18 = vld [vmem:[%s907_s4 + $0x38] sm:$0xff] (%p209_p0) }
 0x138   : > { %v369_v25 = vadd.f32 %v325_v35, %v220_v17  ;;  %v456_v17 = vld [vmem:[%s907_s4 + $0x40] sm:$0xff] (%p209_p0)  ;;  %558 = vmatpush.msra.mxu2 (%p209_p0), %v457_v16  ;;  %559 = vmatpush.msra.mxu3 (%p209_p0), %v457_v16  ;;  %v453_v35 = vld [vmem:[%s907_s4 + $0x28] sm:$0xff] (%p209_p0) }
 0x139   : > { %v535_v36 = vmul.f32 -1.442695, %v368_v19  ;;  %474 = vmatpush.msra.mxu0 (%p209_p0), %v457_v16  ;;  %557 = vmatpush.msra.mxu1 (%p209_p0), %v457_v16  ;;  %v454_v19 = vld [vmem:[%s907_s4 + $0x30] sm:$0xff] (%p209_p0) }
 0x13a   : > { %v536_v37 = vmul.f32 -1.442695, %v369_v25  ;;  %561 = vmatpush.msra.mxu2 (%p209_p0), %v456_v17  ;;  %562 = vmatpush.msra.mxu3 (%p209_p0), %v456_v17  ;;  %v452_v25 = vld [vmem:[%s907_s4 + $0x20] sm:$0xff] (%p209_p0) }
 0x13b   : > { %603 = vpow2.f32 %v535_v36  ;;  %475 = vmatpush.msra.mxu0 (%p209_p0), %v456_v17  ;;  %560 = vmatpush.msra.mxu1 (%p209_p0), %v456_v17  ;;  %v451_v36 = vld [vmem:[%s907_s4 + $0x18] sm:$0xff] (%p209_p0) }
 0x13c   : > { %605 = vpow2.f32 %v536_v37  ;;  %564 = vmatpush.msra.mxu2 (%p209_p0), %v455_v18  ;;  %565 = vmatpush.msra.mxu3 (%p209_p0), %v455_v18  ;;  %v450_v37 = vld [vmem:[%s907_s4 + $0x10] sm:$0xff] (%p209_p0) }
 0x13d   : > { %v365_v39 = vpop.f32.mrf.mxu3  ;;  %476 = vmatpush.msra.mxu0 (%p209_p0), %v455_v18  ;;  %563 = vmatpush.msra.mxu1 (%p209_p0), %v455_v18 }
 0x13e   : > { %v371_v40 = vadd.f32 %v365_v39, %v222_v38  ;;  %567 = vmatpush.msra.mxu2 (%p209_p0), %v454_v19  ;;  %568 = vmatpush.msra.mxu3 (%p209_p0), %v454_v19  ;;  %v449_v38 = vld [vmem:[%s907_s4 + $0x8] sm:$0xff] (%p209_p0)  ;;  %v448_v39 = vld [vmem:[%s907_s4] sm:$0xff] (%p209_p0) }
 0x13f   :  { %477 = vmatpush.msra.mxu0 (%p209_p0), %v454_v19  ;;  %566 = vmatpush.msra.mxu1 (%p209_p0), %v454_v19 }
 0x140   : > { %v537_v41 = vmul.f32 -1.442695, %v371_v40  ;;  %570 = vmatpush.msra.mxu2 (%p209_p0), %v453_v35  ;;  %571 = vmatpush.msra.mxu3 (%p209_p0), %v453_v35 }
 0x141   : > { %v604_v42 = vpop.eup %603  ;;  %478 = vmatpush.msra.mxu0 (%p209_p0), %v453_v35  ;;  %569 = vmatpush.msra.mxu1 (%p209_p0), %v453_v35 }
 0x142   : > { %v606_v43 = vpop.eup %605  ;;  %v375_v44 = vadd.f32 1.0, %v604_v42  ;;  %607 = vpow2.f32 %v537_v41  ;;  %573 = vmatpush.msra.mxu2 (%p209_p0), %v452_v25  ;;  %574 = vmatpush.msra.mxu3 (%p209_p0), %v452_v25 }
 0x143   : > { %v394_v45 = vadd.f32 1.0, %v606_v43  ;;  %v345_v47 = vpop.f32.mrf.mxu2  ;;  %479 = vmatpush.msra.mxu0 (%p209_p0), %v452_v25  ;;  %572 = vmatpush.msra.mxu1 (%p209_p0), %v452_v25 }
 0x144   : > { %609 = vrcp.f32 %v375_v44  ;;  %v370_v49 = vadd.f32 %v345_v47, %v221_v46  ;;  %v387_v57 = vand.u32 2147483648, %v375_v44  ;;  %v385_v60 = vand.u32 2147483647, %v375_v44  ;;  %576 = vmatpush.msra.mxu2 (%p209_p0), %v451_v36  ;;  %577 = vmatpush.msra.mxu3 (%p209_p0), %v451_v36 }
 0x145   : > { %611 = vrcp.f32 %v394_v45  ;;  %v406_v58 = vand.u32 2147483648, %v394_v45  ;;  %v404_v62 = vand.u32 2147483647, %v394_v45  ;;  %vm381_vm2 = vweird.f32 %v375_v44  ;;  %480 = vmatpush.msra.mxu0 (%p209_p0), %v451_v36  ;;  %575 = vmatpush.msra.mxu1 (%p209_p0), %v451_v36 }
 0x146   : > { %vm400_vm3 = vweird.f32 %v394_v45  ;;  %v388_v3 = vor.u32 1.1754944e-38, %v387_v57  ;;  %vm386_vm6 = vcmp.eq.f32.partialorder %v385_v60, 8.507059e+37  ;;  %579 = vmatpush.msra.mxu2 (%p209_p0), %v450_v37  ;;  %580 = vmatpush.msra.mxu3 (%p209_p0), %v450_v37 }
 0x147   : > { %v407_v5 = vor.u32 1.1754944e-38, %v406_v58  ;;  %vm405_vm7 = vcmp.eq.f32.partialorder %v404_v62, 8.507059e+37  ;;  %481 = vmatpush.msra.mxu0 (%p209_p0), %v450_v37  ;;  %578 = vmatpush.msra.mxu1 (%p209_p0), %v450_v37 }
 0x148   : > { %v608_v48 = vpop.eup %607  ;;  %582 = vmatpush.msra.mxu2 (%p209_p0), %v449_v38  ;;  %583 = vmatpush.msra.mxu3 (%p209_p0), %v449_v38 }
 0x149   : > { %v414_v50 = vadd.f32 1.0, %v608_v48  ;;  %482 = vmatpush.msra.mxu0 (%p209_p0), %v449_v38  ;;  %581 = vmatpush.msra.mxu1 (%p209_p0), %v449_v38  ;;  %v619_v48 = vld [vmem:[#allocation6] ss:$0 sm:$0xff] (%p209_p0) }
 0x14a   : > { %v610_v51 = vpop.eup %609  ;;  %585 = vmatpush.msra.mxu2 (%p209_p0), %v448_v39  ;;  %586 = vmatpush.msra.mxu3 (%p209_p0), %v448_v39 }
 0x14b   : > { %v612_v52 = vpop.eup %611  ;;  %v377_v53 = vmul.f32 %v610_v51, %v375_v44  ;;  %613 = vrcp.f32 %v414_v50  ;;  %vm382_vm0 = vweird.f32 %v610_v51  ;;  %v426_v24 = vand.u32 2147483648, %v414_v50  ;;  %483 = vmatpush.msra.mxu0 (%p209_p0), %v448_v39  ;;  %584 = vmatpush.msra.mxu1 (%p209_p0), %v448_v39 }
 0x14c   : > { %v396_v54 = vmul.f32 %v612_v52, %v394_v45  ;;  %615 = vtanh.f32 %v370_v49  ;;  %vm401_vm1 = vweird.f32 %v612_v52  ;;  %vm383_vm4 = vmor %vm381_vm2, %vm382_vm0  ;;  %vm420_vm9 = vweird.f32 %v414_v50 }
 0x14d   : > { %v378_v55 = vsub.f32 1.0, %v377_v53  ;;  %vm402_vm5 = vmor %vm400_vm3, %vm401_vm1  ;;  %v424_v26 = vand.u32 2147483647, %v414_v50  ;;  %v427_v28 = vor.u32 1.1754944e-38, %v426_v24 }
 0x14e   : > { %v397_v56 = vsub.f32 1.0, %v396_v54 }
 0x14f   : > { %v379_v59 = vmul.f32 %v610_v51, %v378_v55  ;;  %vm425_vm11 = vcmp.eq.f32.partialorder %v424_v26, 8.507059e+37 }
 0x150   : > { %v398_v61 = vmul.f32 %v612_v52, %v397_v56 }
 0x151   : > { %v614_v63 = vpop.eup %613  ;;  %v380_v0 = vadd.f32 %v610_v51, %v379_v59 }
 0x152   : > { %v616_v1 = vpop.eup %615  ;;  %v416_v2 = vmul.f32 %v614_v63, %v414_v50  ;;  %v399_v4 = vadd.f32 %v612_v52, %v398_v61  ;;  %vm421_vm8 = vweird.f32 %v614_v63 }
 0x153   : > { %v384_v6 = vsel %vm383_vm4, %v610_v51, %v380_v0  ;;  %vm422_vm10 = vmor %vm420_vm9, %vm421_vm8 }
 0x154   : > { %v417_v8 = vsub.f32 1.0, %v416_v2  ;;  %v389_v9 = vsel %vm386_vm6, %v388_v3, %v384_v6  ;;  %v403_v10 = vsel %vm402_vm5, %v612_v52, %v399_v4 }
 0x155   : > { %v408_v11 = vsel %vm405_vm7, %v407_v5, %v403_v10  ;;  %v432_v12 = vmul.f32 %v616_v1, %v389_v9 }
 0x156   : > { %v418_v20 = vmul.f32 %v614_v63, %v417_v8  ;;  %v431_v21 = vmul.f32 %v430_v7, %v408_v11 }
 0x158   : > { %v433_v22 = vadd.f32 %v432_v12, %v431_v21  ;;  %v419_v23 = vadd.f32 %v614_v63, %v418_v20 }
 0x15a   : > { %617 = vtanh.f32 %v433_v22  ;;  %436 = vst [vmem:[#allocation5] sm:$0xff] %v433_v22  ;;  %v423_v27 = vsel %vm422_vm10, %v614_v63, %v419_v23 }
 0x15b   : > { %v428_v30 = vsel %vm425_vm11, %v427_v28, %v423_v27 }
 0x160   : > { %v618_v29 = vpop.eup %617  ;;  %211 = sbr.rel (!%p209_p0) target bundleno = 153 (0x99), region = 57 }
 0x161   : > { %v435_v31 = vmul.f32 %v618_v29, %v428_v30 }
 0x163   : > { %437 = vst [vmem:[#allocation4] sm:$0xff] %v435_v31 }
 0x164   : > { %439 = vst [vmem:[%s438_s26] sm:$0xff] %v435_v31 }
 0x16b   :  { %v444_v40 = vld [vmem:[#allocation3 + $0x20] sm:$0xff]  ;;  %v446_v41 = vld [vmem:[#allocation3 + $0x30] sm:$0xff]  ;;  %v445_v44 = vld [vmem:[#allocation3 + $0x28] sm:$0xff] }
 0x16c   :  { %v440_v42 = vld [vmem:[#allocation3] sm:$0xff]  ;;  %v442_v43 = vld [vmem:[#allocation3 + $0x10] sm:$0xff]  ;;  %496 = vmatmul.f32.vlgmr.msra.gmra.mxu2 %v444_v40  ;;  %502 = vmatmul.f32.vlgmr.msra.gmra.mxu3 %v446_v41  ;;  %v447_v45 = vld [vmem:[#allocation3 + $0x38] sm:$0xff] }
 0x16d   :  { %484 = vmatmul.f32.vlgmr.msra.gmra.mxu0 %v440_v42  ;;  %490 = vmatmul.f32.vlgmr.msra.gmra.mxu1 %v442_v43  ;;  %v441_v46 = vld [vmem:[#allocation3 + $0x8] sm:$0xff]  ;;  %v443_v47 = vld [vmem:[#allocation3 + $0x18] sm:$0xff] }
 0x174   :  { %499 = vmatmul.f32.gmra.mxu2 %v445_v44  ;;  %505 = vmatmul.f32.gmra.mxu3 %v447_v45 }
 0x175   :  { %487 = vmatmul.f32.gmra.mxu0 %v441_v46  ;;  %493 = vmatmul.f32.gmra.mxu1 %v443_v47 }
 0x1ea   :  { %v485_v49 = vpop.f32.mrf.mxu0  ;;  %v491_v50 = vpop.f32.mrf.mxu1 }
 0x1eb   :  { %v486_v51 = vadd.f32 %v619_v48, %v485_v49  ;;  %v492_v52 = vadd.f32 %v619_v48, %v491_v50 }
 0x1ed   :  { %510 = vst.msk [vmem:[%s909_s6] sm:$0xff] %vm509_vm12, %v486_v51 }
 0x1ee   :  { %512 = vst.msk [vmem:[%s909_s6 + $0x10] sm:$0xff] %vm509_vm12, %v492_v52 }
 0x1ef   :  { %v497_v53 = vpop.f32.mrf.mxu2  ;;  %v503_v54 = vpop.f32.mrf.mxu3 }
 0x1f0   :  { %v498_v55 = vadd.f32 %v619_v48, %v497_v53  ;;  %v504_v56 = vadd.f32 %v619_v48, %v503_v54 }
 0x1f2   :  { %514 = vst.msk [vmem:[%s909_s6 + $0x20] sm:$0xff] %vm509_vm12, %v498_v55  ;;  %v488_v57 = vpop.f32.mrf.mxu0  ;;  %v494_v58 = vpop.f32.mrf.mxu1 }
 0x1f3   :  { %516 = vst.msk [vmem:[%s909_s6 + $0x30] sm:$0xff] %vm509_vm12, %v504_v56  ;;  %v489_v59 = vadd.f32 %v619_v48, %v488_v57  ;;  %v495_v60 = vadd.f32 %v619_v48, %v494_v58 }
 0x1f5   :  { %511 = vst.msk [vmem:[%s909_s6 + $0x8] sm:$0xff] %vm509_vm12, %v489_v59 }
 0x1f6   :  { %513 = vst.msk [vmem:[%s909_s6 + $0x18] sm:$0xff] %vm509_vm12, %v495_v60 }
 0x1f7   :  { %v500_v61 = vpop.f32.mrf.mxu2  ;;  %v506_v62 = vpop.f32.mrf.mxu3 }
 0x1f8   :  { %v501_v63 = vadd.f32 %v619_v48, %v500_v61  ;;  %v507_v0 = vadd.f32 %v619_v48, %v506_v62 }
 0x1fa   :  { %515 = vst.msk [vmem:[%s909_s6 + $0x28] sm:$0xff] %vm509_vm12, %v501_v63 }
 0x1fb   :  { %517 = vst.msk [vmem:[%s909_s6 + $0x38] sm:$0xff] %vm509_vm12, %v507_v0 }
 0x1fc   :  { %522 = vsyncpa [#allocation8], 1 }

</bundles_post_ra>
